<compile_context>
chip_gen: v6e
topology: v6e:2x2x1
jax: 0.10.0
libtpu: 0.0.40
codegen_flags: <defaults>
</compile_context>

<pallas_src>
import jax
import jax.numpy as jnp
from jax.experimental import pallas as pl
from jax.experimental.pallas import tpu as pltpu

_LANE = 128


def _round_up(n, m):
    return ((n + m - 1) // m) * m


def _make_mlp_kernel(num_hidden_layers, mxu_dtype):
    """kernel(x_ref, W_1, b_1, ..., W_n, b_n, W_out, b_out, out_ref)
       W_i : (d_in_pad, d_out_pad) in mxu_dtype, b_i : (1, d_out_pad) f32."""

    def kernel(x_ref, *refs):
        out_ref = refs[-1]
        params = refs[:-1]

        h = x_ref[...]                                   # (TB, D) mxu_dtype
        p = 0
        for _ in range(num_hidden_layers):
            w = params[p][...]                           # (d_in_pad, d_out_pad)
            b = params[p + 1][...]                       # (1, d_out_pad) f32
            p += 2
            z = jnp.dot(h, w, preferred_element_type=jnp.float32) + b
            a = jnp.maximum(z, 0.0)                      # ReLU (f32 on the VPU)
            h = a.astype(mxu_dtype)                      # MXU operand dtype
        w = params[p][...]                               # (d_last_pad, 128)
        b = params[p + 1][...]                           # (1, 128) f32
        out = jnp.dot(h, w, preferred_element_type=jnp.float32) + b
        out_ref[...] = out.astype(out_ref.dtype)         # lane-dense (TB, 128)

    return kernel


def fold_bn_into_linear(W, b, gamma, beta, mean, var, eps=1e-5):
    """Fold eval-mode BatchNorm1d into the preceding Linear.
       W: (d_out, d_in) PyTorch layout; b/gamma/beta/mean/var: (d_out,).
       Returns (W_f (d_in, d_out), b_f (d_out,))."""
    scale = gamma / jnp.sqrt(var + eps)
    W_f = (W * scale[:, None]).T
    b_f = (b - mean) * scale + beta
    return W_f, b_f


def mlp_forward(x, folded_params, *, batch_tile=512, mxu_dtype=jnp.float32):
    """x: (B, D_in) f32.
       folded_params: list of (W (d_in, d_out), b (d_out,)); last = final Linear to 1.
       Returns (B, 1) f32."""
    B, D = x.shape
    n_layers = len(folded_params)

    # ---- batch tile: large (amortize ~0.35us/step), multiple of 8, and keep
    # the grid >= 2 steps when the batch allows so both v7x TCs get work. ----
    tb = max(8, min(batch_tile, _round_up(B, 8)))
    tb = _round_up(tb, 8)
    if B >= 16 and pl.cdiv(B, tb) < 2:
        tb = _round_up(pl.cdiv(B, 2), 8)
    B_pad = _round_up(B, tb)
    if B_pad != B:
        x = jnp.pad(x, ((0, B_pad - B), (0, 0)))
    x = x.astype(mxu_dtype)

    # ---- zero-pad every layer to 128-lane widths; cast weights to MXU dtype.
    padded = []
    prev_pad = D
    for li, (w, b) in enumerate(folded_params):
        din, dout = w.shape
        dout_pad = _round_up(dout, _LANE)
        w_p = jnp.zeros((prev_pad, dout_pad), jnp.float32).at[:din, :dout].set(w)
        b_p = jnp.zeros((1, dout_pad), jnp.float32).at[0, :dout].set(b)
        padded.append((w_p.astype(mxu_dtype), b_p))
        prev_pad = dout_pad
    out_pad = prev_pad                                   # final width (128)

    grid = (B_pad // tb,)
    in_specs = [pl.BlockSpec((tb, D), lambda i: (i, 0))]
    args = [x]
    for (w_p, b_p) in padded:
        din_p, dout_p = w_p.shape
        in_specs.append(pl.BlockSpec((din_p, dout_p), lambda i: (0, 0)))
        in_specs.append(pl.BlockSpec((1, dout_p), lambda i: (0, 0)))
        args.append(w_p)
        args.append(b_p)

    out_shape = jax.ShapeDtypeStruct((B_pad, out_pad), jnp.float32)
    out_specs = pl.BlockSpec((tb, out_pad), lambda i: (i, 0))

    # ---- explicit VMEM budget (double-buffered I/O + weights + activations),
    # capped at 32 MiB so it is safe on v7x's 64 MiB physical VMEM. ----
    itemsize = jnp.dtype(mxu_dtype).itemsize
    x_tile_bytes = tb * D * itemsize
    out_tile_bytes = tb * out_pad * 4
    weight_bytes = sum(w.size * w.dtype.itemsize + b.size * 4 for w, b in padded)
    act_bytes = tb * max(w.shape[1] for w, _ in padded) * 4
    vmem_limit_bytes = int(min(
        32 << 20,
        max(8 << 20,
            2 * (x_tile_bytes + out_tile_bytes) + 2 * weight_bytes
            + 4 * act_bytes + (2 << 20))))

    flops = 2 * B_pad * sum(w.shape[0] * w.shape[1] for w, _ in padded)
    bytes_accessed = (B_pad * D * itemsize + weight_bytes
                      + B_pad * out_pad * 4)
    cost = pl.CostEstimate(flops=flops, transcendentals=0,
                           bytes_accessed=bytes_accessed)

    kernel = _make_mlp_kernel(n_layers - 1, mxu_dtype)
    out = pl.pallas_call(
        kernel,
        out_shape=out_shape,
        grid=grid,
        in_specs=in_specs,
        out_specs=out_specs,
        compiler_params=pltpu.CompilerParams(
            dimension_semantics=("parallel",),
            vmem_limit_bytes=vmem_limit_bytes),
        cost_estimate=cost,
    )(*args)

    return out[:B, :1]                                   # un-pad batch & lanes


if __name__ == "__main__":
    B = 256
    input_size = 32
    hidden_dims = (64, 32)
    dropout = 0.5                                        # identity in eval mode
    eps = 1e-5

    key = jax.random.PRNGKey(0)
    keys = iter(jax.random.split(key, 64))

    x = jax.random.normal(next(keys), (B, input_size), dtype=jnp.float32)

    layers = []
    din = input_size
    for dout in hidden_dims:
        lim = (1.0 / din) ** 0.5
        W = jax.random.uniform(next(keys), (dout, din), jnp.float32, -lim, lim)
        b = jax.random.uniform(next(keys), (dout,), jnp.float32, -lim, lim)
        gamma = jax.random.uniform(next(keys), (dout,), jnp.float32, 0.5, 1.5)
        beta = 0.1 * jax.random.normal(next(keys), (dout,), jnp.float32)
        mean = 0.1 * jax.random.normal(next(keys), (dout,), jnp.float32)
        var = jax.random.uniform(next(keys), (dout,), jnp.float32, 0.5, 1.5)
        layers.append((W, b, gamma, beta, mean, var))
        din = dout

    lim = (1.0 / din) ** 0.5
    W_out = jax.random.uniform(next(keys), (1, din), jnp.float32, -lim, lim)
    b_out = jax.random.uniform(next(keys), (1,), jnp.float32, -lim, lim)

    folded = [fold_bn_into_linear(W, b, g, be, m, v, eps)
              for (W, b, g, be, m, v) in layers]
    folded.append((W_out.T, b_out))

    # Pure-JAX reference (mirrors the PyTorch eval-mode forward, un-folded).
    h = x
    for (W, b, g, be, m, v) in layers:
        z = h @ W.T + b
        z = g * (z - m) / jnp.sqrt(v + eps) + be
        h = jnp.maximum(z, 0.0)
    ref = h @ W_out.T + b_out                            # (B, 1)

    # f32 MXU path (bit-accurate to ~1e-5).
    out_f32 = jax.block_until_ready(mlp_forward(x, folded, batch_tile=512,
                                                mxu_dtype=jnp.float32))
    assert out_f32.shape == (B, 1), out_f32.shape
    err = float(jnp.max(jnp.abs(out_f32 - ref)))
    assert jnp.allclose(out_f32, ref, atol=1e-4, rtol=1e-4), f"f32 mismatch {err}"

    # bf16 MXU-operand path (f32 accumulation) — v6e/v7x fast path.
    out_bf16 = jax.block_until_ready(mlp_forward(x, folded, batch_tile=512,
                                                 mxu_dtype=jnp.bfloat16))
    err = float(jnp.max(jnp.abs(out_bf16 - ref)))
    assert jnp.allclose(out_bf16, ref, atol=3e-2, rtol=3e-2), f"bf16 mismatch {err}"

    print("KERNEL_OK")
</pallas_src>

<mosaic_0001>
module attributes {stable_mosaic.version = 11 : i64} {
  func.func @kernel(%arg0: i32, %arg1: memref<128x32xf32, #tpu.memory_space<vmem>>, %arg2: memref<32x128xf32, #tpu.memory_space<vmem>>, %arg3: memref<1x128xf32, #tpu.memory_space<vmem>>, %arg4: memref<128x128xf32, #tpu.memory_space<vmem>>, %arg5: memref<1x128xf32, #tpu.memory_space<vmem>>, %arg6: memref<128x128xf32, #tpu.memory_space<vmem>>, %arg7: memref<1x128xf32, #tpu.memory_space<vmem>>, %arg8: memref<128x128xf32, #tpu.memory_space<vmem>>) attributes {dimension_semantics = [#tpu.dimension_semantics<parallel>], iteration_bounds = array<i64: 2>, scalar_prefetch = 0 : i64, scratch_operands = 0 : i64, tpu.core_type = #tpu.core_type<tc>, window_params = [{transform_indices = @transform_0, window_bounds = array<i64: 128, 32>}, {pipeline_mode = #tpu.pipeline_mode<synchronous>, transform_indices = @transform_1, window_bounds = array<i64: 32, 128>}, {pipeline_mode = #tpu.pipeline_mode<synchronous>, transform_indices = @transform_2, window_bounds = array<i64: 1, 128>}, {pipeline_mode = #tpu.pipeline_mode<synchronous>, transform_indices = @transform_3, window_bounds = array<i64: 128, 128>}, {pipeline_mode = #tpu.pipeline_mode<synchronous>, transform_indices = @transform_4, window_bounds = array<i64: 1, 128>}, {pipeline_mode = #tpu.pipeline_mode<synchronous>, transform_indices = @transform_5, window_bounds = array<i64: 128, 128>}, {pipeline_mode = #tpu.pipeline_mode<synchronous>, transform_indices = @transform_6, window_bounds = array<i64: 1, 128>}, {transform_indices = @transform_7, window_bounds = array<i64: 128, 128>}]} {
    %c0 = arith.constant 0 : index
    %c0_0 = arith.constant 0 : index
    %0 = vector.load %arg1[%c0, %c0_0] : memref<128x32xf32, #tpu.memory_space<vmem>>, vector<128x32xf32>
    %c0_1 = arith.constant 0 : index
    %c0_2 = arith.constant 0 : index
    %1 = vector.load %arg2[%c0_1, %c0_2] : memref<32x128xf32, #tpu.memory_space<vmem>>, vector<32x128xf32>
    %c0_3 = arith.constant 0 : index
    %c0_4 = arith.constant 0 : index
    %2 = vector.load %arg3[%c0_3, %c0_4] : memref<1x128xf32, #tpu.memory_space<vmem>>, vector<1x128xf32>
    %cst = arith.constant dense<0.000000e+00> : vector<128x128xf32>
    %3 = tpu.matmul %0, %1, %cst {dimension_numbers = #tpu.dot_dimension_numbers<[1], [0], [0], [1], [0, 0, 1, 1], [], []>} : vector<128x32xf32>, vector<32x128xf32>, vector<128x128xf32> -> vector<128x128xf32>
    %4 = vector.broadcast %2 : vector<1x128xf32> to vector<128x128xf32>
    %5 = arith.addf %3, %4 : vector<128x128xf32>
    %cst_5 = arith.constant 0.000000e+00 : f32
    %6 = vector.broadcast %cst_5 : f32 to vector<128x128xf32>
    %7 = arith.maximumf %5, %6 : vector<128x128xf32>
    %c0_6 = arith.constant 0 : index
    %c0_7 = arith.constant 0 : index
    %8 = vector.load %arg4[%c0_6, %c0_7] : memref<128x128xf32, #tpu.memory_space<vmem>>, vector<128x128xf32>
    %c0_8 = arith.constant 0 : index
    %c0_9 = arith.constant 0 : index
    %9 = vector.load %arg5[%c0_8, %c0_9] : memref<1x128xf32, #tpu.memory_space<vmem>>, vector<1x128xf32>
    %cst_10 = arith.constant dense<0.000000e+00> : vector<128x128xf32>
    %10 = tpu.matmul %7, %8, %cst_10 {dimension_numbers = #tpu.dot_dimension_numbers<[1], [0], [0], [1], [0, 0, 1, 1], [], []>} : vector<128x128xf32>, vector<128x128xf32>, vector<128x128xf32> -> vector<128x128xf32>
    %11 = vector.broadcast %9 : vector<1x128xf32> to vector<128x128xf32>
    %12 = arith.addf %10, %11 : vector<128x128xf32>
    %cst_11 = arith.constant 0.000000e+00 : f32
    %13 = vector.broadcast %cst_11 : f32 to vector<128x128xf32>
    %14 = arith.maximumf %12, %13 : vector<128x128xf32>
    %c0_12 = arith.constant 0 : index
    %c0_13 = arith.constant 0 : index
    %15 = vector.load %arg6[%c0_12, %c0_13] : memref<128x128xf32, #tpu.memory_space<vmem>>, vector<128x128xf32>
    %c0_14 = arith.constant 0 : index
    %c0_15 = arith.constant 0 : index
    %16 = vector.load %arg7[%c0_14, %c0_15] : memref<1x128xf32, #tpu.memory_space<vmem>>, vector<1x128xf32>
    %cst_16 = arith.constant dense<0.000000e+00> : vector<128x128xf32>
    %17 = tpu.matmul %14, %15, %cst_16 {dimension_numbers = #tpu.dot_dimension_numbers<[1], [0], [0], [1], [0, 0, 1, 1], [], []>} : vector<128x128xf32>, vector<128x128xf32>, vector<128x128xf32> -> vector<128x128xf32>
    %18 = vector.broadcast %16 : vector<1x128xf32> to vector<128x128xf32>
    %19 = arith.addf %17, %18 : vector<128x128xf32>
    %c0_17 = arith.constant 0 : index
    %c0_18 = arith.constant 0 : index
    %20 = vector.load %arg8[%c0_17, %c0_18] : memref<128x128xf32, #tpu.memory_space<vmem>>, vector<128x128xf32>
    tpu.vector_store %arg8[%c0_17, %c0_18], %19 {strides = array<i32>} : memref<128x128xf32, #tpu.memory_space<vmem>>, vector<128x128xf32>,
    return
  }
  func.func @transform_0(%arg0: i32) -> (i32, i32) {
    %c0_i32 = arith.constant 0 : i32
    %c0_i32_0 = arith.constant 0 : i32
    return %arg0, %c0_i32 : i32, i32
  }
  func.func @transform_1(%arg0: i32) -> (i32, i32) {
    %c0_i32 = arith.constant 0 : i32
    %c0_i32_0 = arith.constant 0 : i32
    %c0_i32_1 = arith.constant 0 : i32
    return %c0_i32, %c0_i32_0 : i32, i32
  }
  func.func @transform_2(%arg0: i32) -> (i32, i32) {
    %c0_i32 = arith.constant 0 : i32
    %c0_i32_0 = arith.constant 0 : i32
    %c0_i32_1 = arith.constant 0 : i32
    return %c0_i32, %c0_i32_0 : i32, i32
  }
  func.func @transform_3(%arg0: i32) -> (i32, i32) {
    %c0_i32 = arith.constant 0 : i32
    %c0_i32_0 = arith.constant 0 : i32
    %c0_i32_1 = arith.constant 0 : i32
    return %c0_i32, %c0_i32_0 : i32, i32
  }
  func.func @transform_4(%arg0: i32) -> (i32, i32) {
    %c0_i32 = arith.constant 0 : i32
    %c0_i32_0 = arith.constant 0 : i32
    %c0_i32_1 = arith.constant 0 : i32
    return %c0_i32, %c0_i32_0 : i32, i32
  }
  func.func @transform_5(%arg0: i32) -> (i32, i32) {
    %c0_i32 = arith.constant 0 : i32
    %c0_i32_0 = arith.constant 0 : i32
    %c0_i32_1 = arith.constant 0 : i32
    return %c0_i32, %c0_i32_0 : i32, i32
  }
  func.func @transform_6(%arg0: i32) -> (i32, i32) {
    %c0_i32 = arith.constant 0 : i32
    %c0_i32_0 = arith.constant 0 : i32
    %c0_i32_1 = arith.constant 0 : i32
    return %c0_i32, %c0_i32_0 : i32, i32
  }
  func.func @transform_7(%arg0: i32) -> (i32, i32) {
    %c0_i32 = arith.constant 0 : i32
    %c0_i32_0 = arith.constant 0 : i32
    return %arg0, %c0_i32 : i32, i32
  }
}

</mosaic_0001>

<bundles_post_ra>
// kernel: tpu_custom_call.1
= control target key start
LH: loop header
LB: loop body
LE: loop exit
PB: predicated region body
PF: predicated region fallthrough
CT: control target
= control target key end

     0   :  { %12 = vsyncpa [#allocation3], 0  ;;  %s1740_s0 = inlined_call_operand.vmem [shape: f32[256,32], index: 0, kind: input, shape index: {}]   ;;  %s1741_s1 = inlined_call_operand.vmem [shape: f32[32,128], index: 1, kind: input, shape index: {}]   ;;  %s1742_s2 = inlined_call_operand.vmem [shape: f32[1,128], index: 2, kind: input, shape index: {}]   ;;  %s1743_s3 = inlined_call_operand.vmem [shape: f32[128,128], index: 3, kind: input, shape index: {}]   ;;  %s1744_s4 = inlined_call_operand.vmem [shape: f32[1,128], index: 4, kind: input, shape index: {}]   ;;  %s1745_s5 = inlined_call_operand.vmem [shape: f32[128,128], index: 5, kind: input, shape index: {}]   ;;  %s1746_s6 = inlined_call_operand.vmem [shape: f32[1,128], index: 6, kind: input, shape index: {}]   ;;  %s1747_s7 = inlined_call_operand.hbm [shape: f32[256,128], index: 7, kind: output, shape index: {}]  }
   0x1   :  { %14 = vsyncpa [#allocation3 + $0x1], 0  ;;  %s1399_s24 = smov 0   ;;  %s1401_s25 = smov 0  }
   0x2   :  { %s1403_s26 = smov 0   ;;  %s1405_s27 = smov 0  }
   0x3 LB: > { %s1420_s28 = sadd.s32 4294967295, %s1354_s27   ;;  %s961_s29 = sadd.s32 4294967294, %s1354_s27   ;;  %s1354_s27 = sphi %s1405_s27, %s1753_s27   ;;  %s1350_s26 = sphi %s1403_s26, %s1752_s26   ;;  %s1346_s25 = sphi %s1401_s25, %s1751_s25   ;;  %s1342_s24 = sphi %s1399_s24, %s1750_s24  }
   0x4   : > { %s1424_s30 = sadd.s32 1, %s1354_s27   ;;  %s179_s8 = sadd.s32 1, %s1350_s26 }
   0x5   : > { %s176_s9 = ssub.s32 %s1354_s27, %s1424_s30  ;;  %p189_p0 = scmp.ne.s32.totalorder %s1350_s26, %s1346_s25 }
   0x6   : > { %p177_p1 = scmp.eq.s32.totalorder %s176_s9, 0  ;;  %p190_p2 = scmp.eq.s32.totalorder %s1420_s28, 1 }
   0x7   : > { %p195_p3 = scmp.ne.s32.totalorder %s1346_s25, %s1342_s24  ;;  %p196_p4 = scmp.eq.s32.totalorder %s961_s29, 1 }
   0x8   : > { %s1435_s10 = scalar_select %p177_p1, %s1350_s26, %s179_s8  }
   0x9   : > { %p1437_p5 = por %p190_p2, %p189_p0  ;;  %p1441_p6 = por %p196_p4, %p195_p3 }
   0xa   : > { %p964_p7 = scmp.ge.s32.totalorder %s1354_s27, 1  ;;  %p241_p8 = scmp.lt.s32.totalorder %s1354_s27, 3 }
   0xc   : > { %p242_p9 = pnand %p964_p7, %p241_p8 }
   0xd   : > { %s966_s17 = sshll.u32 (!%p242_p9), %s1420_s28, 4  ;;  %s270_s8 = sand.u32 (!%p242_p9), 1, %s1346_s25  }
   0xe   : > { %245 = sbr.rel (%p242_p9) target bundleno = 667 (0x29b), region = 48  ;;  %p274_p10 = scmp.lt.s32.totalorder (!%p242_p9), %s966_s17, 31 }
   0xf   : > { %s965_s9 = sshll.u32 (!%p242_p9), %s270_s8, 7  ;;  %s992_s15 = sshll.u32 (!%p242_p9), %s1420_s28, 11 }
  0x10   : > { %s1700_s28 = scalar_lea.sflag (!%p242_p9), [#allocation3], %s270_s8  ;;  %s1356_s22 = smov (!%p242_p9), [#allocation2]  }
  0x11   : > { %s1298_s23 = sshll.u32 (!%p242_p9), %s1356_s22, 4  ;;  %s1299_s23 = int_to_ptr.vmem [resolvable:$false] %s1298_s23 }
  0x12   : > { %s1300_s29 = scalar_lea.vmem (!%p242_p9), %s1299_s23, 4096 }
  0x13   : > { %v299_v0 = vld [vmem:[%s1741_s1 + $0x18] sm:$0xff]  ;;  %v298_v1 = vld [vmem:[%s1741_s1 + $0x10] sm:$0xff]  ;;  %v297_v4 = vld [vmem:[%s1741_s1 + $0x8] sm:$0xff]  ;;  %s1755_s17 = smov (!%p274_p10, %s966_s17), 31  ;;  %vm307_vm0 = vcmask 261120  }
  0x14   : > { %1077 = vmatprep.subr.mxu0 %v299_v0  ;;  %v532_v2 = vld [vmem:[%s1743_s3 + $0x78] sm:$0xff]  ;;  %v531_v3 = vld [vmem:[%s1743_s3 + $0x70] sm:$0xff]  ;;  %v530_v5 = vld [vmem:[%s1743_s3 + $0x68] sm:$0xff]  ;;  %s967_s14 = sshll.u32 %s1755_s17, 3  ;;  %s1692_s17 = scalar_lea.hbm %s1747_s7, %s992_s15 }
  0x15   : > { %1078 = vmatpush3.msra.mxu0 %v299_v0  ;;  %1109 = vmatprep.subr.mxu1 %v532_v2  ;;  %v296_v6 = vld [vmem:[%s1741_s1] sm:$0xff]  ;;  %s1472_s18 = scalar_lea.vmem %s1740_s0, %s967_s14  ;;  %v528_v11 = vld [vmem:[%s1743_s3 + $0x58] sm:$0xff]  ;;  %v527_v13 = vld [vmem:[%s1743_s3 + $0x50] sm:$0xff] }
  0x16   : > { %1079 = vmatprep.subr.mxu0 %v298_v1  ;;  %1110 = vmatpush3.msra.mxu1 %v532_v2  ;;  %v529_v7 = vld [vmem:[%s1743_s3 + $0x60] sm:$0xff]  ;;  %v281_v9 = vld [vmem:[%s1472_s18 + $0x8] sm:$0xff]  ;;  %v282_v10 = vld [vmem:[%s1472_s18 + $0x10] sm:$0xff] }
  0x17   : > { %1080 = vmatpush3.msra.mxu0 %v298_v1  ;;  %1111 = vmatprep.subr.mxu1 %v531_v3  ;;  %v280_v8 = vld [vmem:[%s1472_s18] sm:$0xff]  ;;  %v283_v12 = vld [vmem:[%s1472_s18 + $0x18] sm:$0xff]  ;;  %v526_v15 = vld [vmem:[%s1743_s3 + $0x48] sm:$0xff] }
  0x18   : > { %1081 = vmatprep.subr.mxu0 %v297_v4  ;;  %1112 = vmatpush3.msra.mxu1 %v531_v3  ;;  %v284_v14 = vld [vmem:[%s1472_s18 + $0x20] sm:$0xff]  ;;  %v285_v16 = vld [vmem:[%s1472_s18 + $0x28] sm:$0xff]  ;;  %v286_v18 = vld [vmem:[%s1472_s18 + $0x30] sm:$0xff] }
  0x19   : > { %1082 = vmatpush3.msra.mxu0 %v297_v4  ;;  %1113 = vmatprep.subr.mxu1 %v530_v5  ;;  %v525_v17 = vld [vmem:[%s1743_s3 + $0x40] sm:$0xff]  ;;  %v524_v19 = vld [vmem:[%s1743_s3 + $0x38] sm:$0xff]  ;;  %v523_v21 = vld [vmem:[%s1743_s3 + $0x30] sm:$0xff] }
  0x1a   : > { %1083 = vmatprep.subr.mxu0 %v296_v6  ;;  %1114 = vmatpush3.msra.mxu1 %v530_v5  ;;  %v287_v20 = vld [vmem:[%s1472_s18 + $0x38] sm:$0xff]  ;;  %v288_v22 = vld [vmem:[%s1472_s18 + $0x40] sm:$0xff]  ;;  %v522_v23 = vld [vmem:[%s1743_s3 + $0x28] sm:$0xff] }
  0x1b   : > { %1084 = vmatpush3.msra.mxu0 %v296_v6  ;;  %1085 = vmatprep.mubr.msk.f32.mxu0 %vm307_vm0, %v280_v8  ;;  %v289_v24 = vld [vmem:[%s1472_s18 + $0x48] sm:$0xff]  ;;  %v521_v25 = vld [vmem:[%s1743_s3 + $0x20] sm:$0xff]  ;;  %v290_v26 = vld [vmem:[%s1472_s18 + $0x50] sm:$0xff] }
  0x1c   : > { %1086 = vmatmul.mubr.msk.f32.vlgmr.msra.gmra.mxu0 %vm307_vm0, %v281_v9  ;;  %1115 = vmatprep.subr.mxu1 %v529_v7  ;;  %v291_v27 = vld [vmem:[%s1472_s18 + $0x58] sm:$0xff]  ;;  %v292_v28 = vld [vmem:[%s1472_s18 + $0x60] sm:$0xff]  ;;  %v293_v29 = vld [vmem:[%s1472_s18 + $0x68] sm:$0xff] }
  0x1d   : > { %1088 = vmatprep.mubr.msk.f32.mxu0 %vm307_vm0, %v282_v10  ;;  %1116 = vmatpush3.msra.mxu1 %v529_v7  ;;  %v294_v30 = vld [vmem:[%s1472_s18 + $0x70] sm:$0xff]  ;;  %v295_v31 = vld [vmem:[%s1472_s18 + $0x78] sm:$0xff]  ;;  %v518_v34 = vld [vmem:[%s1743_s3 + $0x8] sm:$0xff]  ;;  %s1671_s18 = scalar_lea.vmem [#allocation2], %s965_s9 }
  0x1e   : > { %1117 = vmatprep.subr.mxu1 %v528_v11  ;;  %v520_v32 = vld [vmem:[%s1743_s3 + $0x18] sm:$0xff]  ;;  %v519_v33 = vld [vmem:[%s1743_s3 + $0x10] sm:$0xff]  ;;  %v517_v35 = vld [vmem:[%s1743_s3] sm:$0xff]  ;;  %s899_s16 = sshll.u32 %s1671_s18, 4  ;;  %s1694_s16 = int_to_ptr.vmem [resolvable:$true] %s899_s16 }
  0x1f   : > { %1118 = vmatpush3.msra.mxu1 %v528_v11  ;;  %v716_v36 = vld [vmem:[%s1745_s5 + $0x78] sm:$0xff]  ;;  %v715_v37 = vld [vmem:[%s1745_s5 + $0x70] sm:$0xff]  ;;  %v714_v38 = vld [vmem:[%s1745_s5 + $0x68] sm:$0xff]  ;;  %s1294_s21 = scalar_lea.vmem %s1694_s16, 2048  ;;  %p1301_p0 = scmp.lt.s32.totalorder %s1694_s16, %s1299_s23 }
  0x20   : > { %1089 = vmatmul.mubr.msk.f32.gmra.mxu0 %vm307_vm0, %v283_v12  ;;  %1119 = vmatprep.subr.mxu1 %v527_v13  ;;  %v713_v39 = vld [vmem:[%s1745_s5 + $0x60] sm:$0xff]  ;;  %v1560_v40 = vld [vmem:[%s1745_s5 + $0x58] sm:$0xff]  ;;  %v1565_v41 = vld [vmem:[%s1745_s5 + $0x50] sm:$0xff]  ;;  %p1295_p11 = scmp.ne.s32.totalorder %s1694_s16, %s1294_s21  ;;  %p1302_p1 = scmp.lt.s32.totalorder %s1300_s29, %s1294_s21 }
  0x21   : > { %1091 = vmatprep.mubr.msk.f32.mxu0 %vm307_vm0, %v284_v14  ;;  %1120 = vmatpush3.msra.mxu1 %v527_v13  ;;  %v1572_v42 = vld [vmem:[%s1745_s5 + $0x48] sm:$0xff]  ;;  %v1579_v43 = vld [vmem:[%s1745_s5 + $0x40] sm:$0xff]  ;;  %v1586_v44 = vld [vmem:[%s1745_s5 + $0x38] sm:$0xff] }
  0x22   : > { %1121 = vmatprep.subr.mxu1 %v526_v15  ;;  %1165 = vmatprep.subr.mxu0 %v716_v36  ;;  %v1593_v45 = vld [vmem:[%s1745_s5 + $0x30] sm:$0xff]  ;;  %v1600_v46 = vld [vmem:[%s1745_s5 + $0x28] sm:$0xff]  ;;  %v1607_v47 = vld [vmem:[%s1745_s5 + $0x20] sm:$0xff]  ;;  %p1296_p12 = pnand %p1295_p11, %p1437_p5  ;;  %p1303_p2 = por %p1302_p1, %p1301_p0 }
  0x23   : > { %1122 = vmatpush3.msra.mxu1 %v526_v15  ;;  %1166 = vmatpush3.msra.mxu0 %v716_v36  ;;  %v1616_v48 = vld [vmem:[%s1742_s2] ss:$0 sm:$0xff] }
  0x24   : > { %1092 = vmatmul.mubr.msk.f32.gmra.mxu0 %vm307_vm0, %v285_v16  ;;  %1123 = vmatprep.subr.mxu1 %v525_v17  ;;  %p1297_p13 = pneg %p1296_p12 }
  0x25   : > { %1094 = vmatprep.mubr.msk.f32.mxu0 %vm307_vm0, %v286_v18  ;;  %1124 = vmatpush3.msra.mxu1 %v525_v17 }
  0x26   : > { %1125 = vmatprep.subr.mxu1 %v524_v19  ;;  %1167 = vmatprep.subr.mxu0 %v715_v37  ;;  %p1304_p3 = pnand %p1303_p2, %p1297_p13 }
  0x27   : > { %1126 = vmatpush3.msra.mxu1 %v524_v19  ;;  %1168 = vmatpush3.msra.mxu0 %v715_v37 }
  0x28   : > { %1095 = vmatmul.mubr.msk.f32.gmra.mxu0 %vm307_vm0, %v287_v20  ;;  %1127 = vmatprep.subr.mxu1 %v523_v21 }
  0x29   : > { %1097 = vmatprep.mubr.msk.f32.mxu0 %vm307_vm0, %v288_v22  ;;  %1128 = vmatpush3.msra.mxu1 %v523_v21 }
  0x2a   : > { %1129 = vmatprep.subr.mxu1 %v522_v23  ;;  %1169 = vmatprep.subr.mxu0 %v714_v38 }
  0x2b   : > { %1130 = vmatpush3.msra.mxu1 %v522_v23  ;;  %1170 = vmatpush3.msra.mxu0 %v714_v38 }
  0x2c   : > { %1098 = vmatmul.mubr.msk.f32.gmra.mxu0 %vm307_vm0, %v289_v24  ;;  %1131 = vmatprep.subr.mxu1 %v521_v25 }
  0x2d   : > { %1100 = vmatprep.mubr.msk.f32.mxu0 %vm307_vm0, %v290_v26  ;;  %1132 = vmatpush3.msra.mxu1 %v521_v25 }
  0x2e   : > { %1133 = vmatprep.subr.mxu1 %v520_v32  ;;  %1171 = vmatprep.subr.mxu0 %v713_v39 }
  0x2f   : > { %1134 = vmatpush3.msra.mxu1 %v520_v32  ;;  %1172 = vmatpush3.msra.mxu0 %v713_v39 }
  0x30   : > { %1101 = vmatmul.mubr.msk.f32.gmra.mxu0 %vm307_vm0, %v291_v27  ;;  %1135 = vmatprep.subr.mxu1 %v519_v33 }
  0x31   : > { %1103 = vmatprep.mubr.msk.f32.mxu0 %vm307_vm0, %v292_v28  ;;  %1136 = vmatpush3.msra.mxu1 %v519_v33  ;;  %v704_v33 = vld [vmem:[%s1745_s5 + $0x18] sm:$0xff] }
  0x32   : > { %1137 = vmatprep.subr.mxu1 %v518_v34  ;;  %1173 = vmatprep.subr.mxu0 %v1560_v40 }
  0x33   : > { %1138 = vmatpush3.msra.mxu1 %v518_v34  ;;  %1174 = vmatpush3.msra.mxu0 %v1560_v40  ;;  %v703_v34 = vld [vmem:[%s1745_s5 + $0x10] sm:$0xff] }
  0x34   : > { %1104 = vmatmul.mubr.msk.f32.gmra.mxu0 %vm307_vm0, %v293_v29  ;;  %1139 = vmatprep.subr.mxu1 %v517_v35 }
  0x35   : > { %1106 = vmatprep.mubr.msk.f32.mxu0 %vm307_vm0, %v294_v30  ;;  %1140 = vmatpush3.msra.mxu1 %v517_v35  ;;  %v702_v35 = vld [vmem:[%s1745_s5 + $0x8] sm:$0xff] }
  0x36   : > { %1221 = vmatprep.subr.mxu1 %v716_v36  ;;  %1175 = vmatprep.subr.mxu0 %v1565_v41 }
  0x37   : > { %1176 = vmatpush3.msra.mxu0 %v1565_v41 }
  0x38   : > { %1107 = vmatmul.mubr.msk.f32.gmra.mxu0 %vm307_vm0, %v295_v31  ;;  %1177 = vmatprep.subr.mxu0 %v1572_v42 }
  0x39   : > { %1178 = vmatpush3.msra.mxu0 %v1572_v42 }
  0x3a   : > { %1179 = vmatprep.subr.mxu0 %v1579_v43 }
  0x3b   : > { %1180 = vmatpush3.msra.mxu0 %v1579_v43 }
  0x3c   : > { %1181 = vmatprep.subr.mxu0 %v1586_v44 }
  0x3d   : > { %1182 = vmatpush3.msra.mxu0 %v1586_v44 }
  0x3e   : > { %1183 = vmatprep.subr.mxu0 %v1593_v45 }
  0x3f   : > { %1184 = vmatpush3.msra.mxu0 %v1593_v45 }
  0x40   : > { %1185 = vmatprep.subr.mxu0 %v1600_v46 }
  0x41   : > { %1186 = vmatpush3.msra.mxu0 %v1600_v46 }
  0x42   : > { %1187 = vmatprep.subr.mxu0 %v1607_v47 }
  0x43   : > { %1188 = vmatpush3.msra.mxu0 %v1607_v47 }
  0x44   : > { %1189 = vmatprep.subr.mxu0 %v704_v33 }
  0x45   : > { %1190 = vmatpush3.msra.mxu0 %v704_v33 }
  0x46   : > { %1191 = vmatprep.subr.mxu0 %v703_v34 }
  0x47   : > { %1192 = vmatpush3.msra.mxu0 %v703_v34 }
  0x48   : > { %1193 = vmatprep.subr.mxu0 %v702_v35 }
  0x49   : > { %1194 = vmatpush3.msra.mxu0 %v702_v35 }
  0xdc   : > { %v1087_v49 = vpop.f32.mrf.mxu0 }
  0xdd   : > { %v428_v50 = vadd.f32 %v1087_v49, %v1616_v48 }
  0xde   : > { %v422_v51 = vpop.f32.mrf.mxu0 }
  0xdf   : > { %v423_v52 = vadd.f32 %v1616_v48, %v422_v51  ;;  %v502_v55 = vmax.f32 %v428_v50, 0.0 }
  0xe0   : > { %v1090_v53 = vpop.f32.mrf.mxu0 }
  0xe1   : > { %v501_v54 = vmax.f32 %v423_v52, 0.0  ;;  %v438_v56 = vadd.f32 %v1090_v53, %v1616_v48 }
  0xe2   : > { %v432_v57 = vpop.f32.mrf.mxu0 }
  0xe3   : > { %v433_v58 = vadd.f32 %v1616_v48, %v432_v57  ;;  %1141 = vmatprep.mubr.f32.mxu1 %v501_v54  ;;  %v504_v61 = vmax.f32 %v438_v56, 0.0 }
  0xe4   : > { %v1093_v59 = vpop.f32.mrf.mxu0  ;;  %1142 = vmatmul.mubr.f32.vlgmr.msra.gmra.mxu1 %v502_v55 }
  0xe5   : > { %v503_v60 = vmax.f32 %v433_v58, 0.0  ;;  %1237 = vmatpush3.msra.mxu1 %v716_v36  ;;  %v448_v62 = vadd.f32 %v1093_v59, %v1616_v48  ;;  %v701_v36 = vld [vmem:[%s1745_s5] sm:$0xff] }
  0xe6   : > { %v442_v63 = vpop.f32.mrf.mxu0  ;;  %1222 = vmatprep.subr.mxu1 %v715_v37  ;;  %1195 = vmatprep.subr.mxu0 %v701_v36 }
  0xe7   : > { %v443_v0 = vadd.f32 %v1616_v48, %v442_v63  ;;  %1144 = vmatprep.mubr.f32.mxu1 %v503_v60  ;;  %1238 = vmatpush3.msra.mxu1 %v715_v37  ;;  %v506_v3 = vmax.f32 %v448_v62, 0.0  ;;  %v985_v37 = vld [vmem:[%s1744_s4] ss:$0 sm:$0xff] }
  0xe8   : > { %v1096_v1 = vpop.f32.mrf.mxu0  ;;  %1145 = vmatmul.mubr.f32.gmra.mxu1 %v504_v61  ;;  %1223 = vmatprep.subr.mxu1 %v714_v38 }
  0xe9   : > { %v505_v2 = vmax.f32 %v443_v0, 0.0  ;;  %1239 = vmatpush3.msra.mxu1 %v714_v38  ;;  %v458_v4 = vadd.f32 %v1096_v1, %v1616_v48  ;;  %1196 = vmatpush3.msra.mxu0 %v701_v36 }
  0xea   : > { %v452_v5 = vpop.f32.mrf.mxu0  ;;  %1224 = vmatprep.subr.mxu1 %v713_v39 }
  0xeb   : > { %v453_v6 = vadd.f32 %v1616_v48, %v452_v5  ;;  %1147 = vmatprep.mubr.f32.mxu1 %v505_v2  ;;  %1240 = vmatpush3.msra.mxu1 %v713_v39  ;;  %v508_v9 = vmax.f32 %v458_v4, 0.0 }
  0xec   : > { %v1099_v7 = vpop.f32.mrf.mxu0  ;;  %1148 = vmatmul.mubr.f32.gmra.mxu1 %v506_v3  ;;  %1225 = vmatprep.subr.mxu1 %v1560_v40 }
  0xed   : > { %v507_v8 = vmax.f32 %v453_v6, 0.0  ;;  %1241 = vmatpush3.msra.mxu1 %v1560_v40  ;;  %v468_v10 = vadd.f32 %v1099_v7, %v1616_v48 }
  0xee   : > { %v462_v11 = vpop.f32.mrf.mxu0  ;;  %1226 = vmatprep.subr.mxu1 %v1565_v41 }
  0xef   : > { %v463_v12 = vadd.f32 %v1616_v48, %v462_v11  ;;  %1150 = vmatprep.mubr.f32.mxu1 %v507_v8  ;;  %1242 = vmatpush3.msra.mxu1 %v1565_v41  ;;  %v510_v15 = vmax.f32 %v468_v10, 0.0 }
  0xf0   : > { %v1102_v13 = vpop.f32.mrf.mxu0  ;;  %1151 = vmatmul.mubr.f32.gmra.mxu1 %v508_v9  ;;  %1227 = vmatprep.subr.mxu1 %v1572_v42 }
  0xf1   : > { %v509_v14 = vmax.f32 %v463_v12, 0.0  ;;  %1243 = vmatpush3.msra.mxu1 %v1572_v42  ;;  %v478_v16 = vadd.f32 %v1102_v13, %v1616_v48 }
  0xf2   : > { %v472_v17 = vpop.f32.mrf.mxu0  ;;  %1228 = vmatprep.subr.mxu1 %v1579_v43 }
  0xf3   : > { %v473_v18 = vadd.f32 %v1616_v48, %v472_v17  ;;  %1153 = vmatprep.mubr.f32.mxu1 %v509_v14  ;;  %1244 = vmatpush3.msra.mxu1 %v1579_v43  ;;  %v512_v21 = vmax.f32 %v478_v16, 0.0 }
  0xf4   : > { %v1105_v19 = vpop.f32.mrf.mxu0  ;;  %1154 = vmatmul.mubr.f32.gmra.mxu1 %v510_v15  ;;  %1229 = vmatprep.subr.mxu1 %v1586_v44 }
  0xf5   : > { %v511_v20 = vmax.f32 %v473_v18, 0.0  ;;  %1245 = vmatpush3.msra.mxu1 %v1586_v44  ;;  %v488_v22 = vadd.f32 %v1105_v19, %v1616_v48 }
  0xf6   : > { %v482_v23 = vpop.f32.mrf.mxu0  ;;  %1230 = vmatprep.subr.mxu1 %v1593_v45 }
  0xf7   : > { %v483_v24 = vadd.f32 %v1616_v48, %v482_v23  ;;  %1156 = vmatprep.mubr.f32.mxu1 %v511_v20  ;;  %1246 = vmatpush3.msra.mxu1 %v1593_v45  ;;  %v514_v27 = vmax.f32 %v488_v22, 0.0  ;;  %v986_v22 = vld [vmem:[%s1746_s6] ss:$0 sm:$0xff] }
  0xf8   : > { %v1108_v25 = vpop.f32.mrf.mxu0  ;;  %1157 = vmatmul.mubr.f32.gmra.mxu1 %v512_v21  ;;  %1231 = vmatprep.subr.mxu1 %v1600_v46 }
  0xf9   : > { %v513_v26 = vmax.f32 %v483_v24, 0.0  ;;  %1247 = vmatpush3.msra.mxu1 %v1600_v46  ;;  %v498_v28 = vadd.f32 %v1108_v25, %v1616_v48 }
  0xfa   : > { %v492_v29 = vpop.f32.mrf.mxu0  ;;  %1232 = vmatprep.subr.mxu1 %v1607_v47 }
  0xfb   : > { %v493_v30 = vadd.f32 %v1616_v48, %v492_v29  ;;  %1159 = vmatprep.mubr.f32.mxu1 %v513_v26  ;;  %1248 = vmatpush3.msra.mxu1 %v1607_v47  ;;  %v516_v32 = vmax.f32 %v498_v28, 0.0 }
  0xfc   : > { %1160 = vmatmul.mubr.f32.gmra.mxu1 %v514_v27  ;;  %1233 = vmatprep.subr.mxu1 %v704_v33 }
  0xfd   : > { %v515_v31 = vmax.f32 %v493_v30, 0.0  ;;  %1249 = vmatpush3.msra.mxu1 %v704_v33 }
  0xfe   : > { %1234 = vmatprep.subr.mxu1 %v703_v34 }
  0xff   : > { %1162 = vmatprep.mubr.f32.mxu1 %v515_v31  ;;  %1250 = vmatpush3.msra.mxu1 %v703_v34 }
 0x100   : > { %1163 = vmatmul.mubr.f32.gmra.mxu1 %v516_v32  ;;  %1235 = vmatprep.subr.mxu1 %v702_v35 }
 0x101   : > { %1251 = vmatpush3.msra.mxu1 %v702_v35 }
 0x102   : > { %1236 = vmatprep.subr.mxu1 %v701_v36 }
 0x103   : > { %1252 = vmatpush3.msra.mxu1 %v701_v36 }
 0x1a4   : > { %v1143_v38 = vpop.f32.mrf.mxu1 }
 0x1a5   : > { %v612_v39 = vadd.f32 %v1143_v38, %v985_v37 }
 0x1a6   : > { %v606_v40 = vpop.f32.mrf.mxu1 }
 0x1a7   : > { %v607_v41 = vadd.f32 %v985_v37, %v606_v40  ;;  %v686_v44 = vmax.f32 %v612_v39, 0.0 }
 0x1a8   : > { %v1146_v42 = vpop.f32.mrf.mxu1 }
 0x1a9   : > { %v685_v43 = vmax.f32 %v607_v41, 0.0  ;;  %v622_v45 = vadd.f32 %v1146_v42, %v985_v37 }
 0x1aa   : > { %v616_v46 = vpop.f32.mrf.mxu1 }
 0x1ab   : > { %v617_v47 = vadd.f32 %v985_v37, %v616_v46  ;;  %1197 = vmatprep.mubr.f32.mxu0 %v685_v43  ;;  %v688_v50 = vmax.f32 %v622_v45, 0.0 }
 0x1ac   : > { %v1149_v48 = vpop.f32.mrf.mxu1  ;;  %1198 = vmatmul.mubr.f32.vlgmr.msra.gmra.mxu0 %v686_v44 }
 0x1ad   : > { %v687_v49 = vmax.f32 %v617_v47, 0.0  ;;  %v632_v51 = vadd.f32 %v1149_v48, %v985_v37 }
 0x1ae   : > { %v626_v52 = vpop.f32.mrf.mxu1 }
 0x1af   : > { %v627_v53 = vadd.f32 %v985_v37, %v626_v52  ;;  %1200 = vmatprep.mubr.f32.mxu0 %v687_v49  ;;  %v690_v56 = vmax.f32 %v632_v51, 0.0 }
 0x1b0   : > { %v1152_v54 = vpop.f32.mrf.mxu1  ;;  %1201 = vmatmul.mubr.f32.gmra.mxu0 %v688_v50 }
 0x1b1   : > { %v689_v55 = vmax.f32 %v627_v53, 0.0  ;;  %v642_v57 = vadd.f32 %v1152_v54, %v985_v37 }
 0x1b2   : > { %v636_v58 = vpop.f32.mrf.mxu1 }
 0x1b3   : > { %v637_v59 = vadd.f32 %v985_v37, %v636_v58  ;;  %1203 = vmatprep.mubr.f32.mxu0 %v689_v55  ;;  %v692_v62 = vmax.f32 %v642_v57, 0.0 }
 0x1b4   : > { %v1155_v60 = vpop.f32.mrf.mxu1  ;;  %1204 = vmatmul.mubr.f32.gmra.mxu0 %v690_v56 }
 0x1b5   : > { %v691_v61 = vmax.f32 %v637_v59, 0.0  ;;  %v652_v63 = vadd.f32 %v1155_v60, %v985_v37 }
 0x1b6   : > { %v646_v0 = vpop.f32.mrf.mxu1 }
 0x1b7   : > { %v647_v1 = vadd.f32 %v985_v37, %v646_v0  ;;  %1206 = vmatprep.mubr.f32.mxu0 %v691_v61  ;;  %v694_v4 = vmax.f32 %v652_v63, 0.0 }
 0x1b8   : > { %v1158_v2 = vpop.f32.mrf.mxu1  ;;  %1207 = vmatmul.mubr.f32.gmra.mxu0 %v692_v62 }
 0x1b9   : > { %v693_v3 = vmax.f32 %v647_v1, 0.0  ;;  %v662_v5 = vadd.f32 %v1158_v2, %v985_v37 }
 0x1ba   : > { %v656_v6 = vpop.f32.mrf.mxu1 }
 0x1bb   : > { %v657_v7 = vadd.f32 %v985_v37, %v656_v6  ;;  %1209 = vmatprep.mubr.f32.mxu0 %v693_v3  ;;  %v696_v10 = vmax.f32 %v662_v5, 0.0 }
 0x1bc   : > { %v1161_v8 = vpop.f32.mrf.mxu1  ;;  %1210 = vmatmul.mubr.f32.gmra.mxu0 %v694_v4 }
 0x1bd   : > { %v695_v9 = vmax.f32 %v657_v7, 0.0  ;;  %v672_v11 = vadd.f32 %v1161_v8, %v985_v37 }
 0x1be   : > { %v666_v12 = vpop.f32.mrf.mxu1 }
 0x1bf   : > { %v667_v13 = vadd.f32 %v985_v37, %v666_v12  ;;  %1212 = vmatprep.mubr.f32.mxu0 %v695_v9  ;;  %v698_v16 = vmax.f32 %v672_v11, 0.0 }
 0x1c0   : > { %v1164_v14 = vpop.f32.mrf.mxu1  ;;  %1213 = vmatmul.mubr.f32.gmra.mxu0 %v696_v10 }
 0x1c1   : > { %v697_v15 = vmax.f32 %v667_v13, 0.0  ;;  %v682_v17 = vadd.f32 %v1164_v14, %v985_v37 }
 0x1c2   : > { %v676_v18 = vpop.f32.mrf.mxu1 }
 0x1c3   : > { %v677_v19 = vadd.f32 %v985_v37, %v676_v18  ;;  %1215 = vmatprep.mubr.f32.mxu0 %v697_v15  ;;  %v700_v21 = vmax.f32 %v682_v17, 0.0 }
 0x1c4   : > { %1216 = vmatmul.mubr.f32.gmra.mxu0 %v698_v16 }
 0x1c5   : > { %v699_v20 = vmax.f32 %v677_v19, 0.0 }
 0x1c7   : > { %1218 = vmatprep.mubr.f32.mxu1 %v699_v20 }
 0x1c8   : > { %1219 = vmatmul.mubr.f32.vlgmr.msra.gmra.mxu1 %v700_v21 }
 0x26c   : > { %v1199_v23 = vpop.f32.mrf.mxu0 }
 0x26d   : > { %v796_v24 = vadd.f32 %v1199_v23, %v986_v22 }
 0x26e   : > { %v790_v25 = vpop.f32.mrf.mxu0 }
 0x26f   : > { %870 = vst [vmem:[%s1671_s18 + $0x8] sm:$0xff] %v796_v24  ;;  %v791_v26 = vadd.f32 %v986_v22, %v790_v25 }
 0x270   : > { %v1202_v27 = vpop.f32.mrf.mxu0 }
 0x271   : > { %869 = vst [vmem:[%s1671_s18] sm:$0xff] %v791_v26  ;;  %v806_v28 = vadd.f32 %v1202_v27, %v986_v22 }
 0x272   : > { %v800_v29 = vpop.f32.mrf.mxu0 }
 0x273   : > { %872 = vst [vmem:[%s1671_s18 + $0x18] sm:$0xff] %v806_v28  ;;  %v801_v30 = vadd.f32 %v986_v22, %v800_v29 }
 0x274   : > { %v1205_v31 = vpop.f32.mrf.mxu0 }
 0x275   : > { %871 = vst [vmem:[%s1671_s18 + $0x10] sm:$0xff] %v801_v30  ;;  %v816_v32 = vadd.f32 %v1205_v31, %v986_v22 }
 0x276   : > { %v810_v33 = vpop.f32.mrf.mxu0 }
 0x277   : > { %874 = vst [vmem:[%s1671_s18 + $0x28] sm:$0xff] %v816_v32  ;;  %v811_v34 = vadd.f32 %v986_v22, %v810_v33 }
 0x278   : > { %v1208_v35 = vpop.f32.mrf.mxu0 }
 0x279   : > { %873 = vst [vmem:[%s1671_s18 + $0x20] sm:$0xff] %v811_v34  ;;  %v826_v36 = vadd.f32 %v1208_v35, %v986_v22 }
 0x27a   : > { %v820_v37 = vpop.f32.mrf.mxu0 }
 0x27b   : > { %876 = vst [vmem:[%s1671_s18 + $0x38] sm:$0xff] %v826_v36  ;;  %v821_v38 = vadd.f32 %v986_v22, %v820_v37 }
 0x27c   : > { %v1211_v39 = vpop.f32.mrf.mxu0 }
 0x27d   : > { %875 = vst [vmem:[%s1671_s18 + $0x30] sm:$0xff] %v821_v38  ;;  %v836_v40 = vadd.f32 %v1211_v39, %v986_v22 }
 0x27e   : > { %v830_v41 = vpop.f32.mrf.mxu0 }
 0x27f   : > { %878 = vst [vmem:[%s1671_s18 + $0x48] sm:$0xff] %v836_v40  ;;  %v831_v42 = vadd.f32 %v986_v22, %v830_v41 }
 0x280   : > { %v1214_v43 = vpop.f32.mrf.mxu0 }
 0x281   : > { %877 = vst [vmem:[%s1671_s18 + $0x40] sm:$0xff] %v831_v42  ;;  %v846_v44 = vadd.f32 %v1214_v43, %v986_v22 }
 0x282   : > { %v840_v45 = vpop.f32.mrf.mxu0 }
 0x283   : > { %880 = vst [vmem:[%s1671_s18 + $0x58] sm:$0xff] %v846_v44  ;;  %v841_v46 = vadd.f32 %v986_v22, %v840_v45 }
 0x284   : > { %v1217_v47 = vpop.f32.mrf.mxu0 }
 0x285   : > { %879 = vst [vmem:[%s1671_s18 + $0x50] sm:$0xff] %v841_v46  ;;  %v856_v48 = vadd.f32 %v1217_v47, %v986_v22 }
 0x286   : > { %v850_v49 = vpop.f32.mrf.mxu0 }
 0x287   : > { %882 = vst [vmem:[%s1671_s18 + $0x68] sm:$0xff] %v856_v48  ;;  %v851_v50 = vadd.f32 %v986_v22, %v850_v49 }
 0x288   : > { %v1220_v51 = vpop.f32.mrf.mxu1 }
 0x289   : > { %881 = vst [vmem:[%s1671_s18 + $0x60] sm:$0xff] %v851_v50  ;;  %v866_v52 = vadd.f32 %v1220_v51, %v986_v22 }
 0x28a   : > { %v860_v53 = vpop.f32.mrf.mxu1 }
 0x28b   : > { %884 = vst [vmem:[%s1671_s18 + $0x78] sm:$0xff] %v866_v52  ;;  %v861_v54 = vadd.f32 %v986_v22, %v860_v53 }
 0x28d   : > { %883 = vst [vmem:[%s1671_s18 + $0x70] sm:$0xff] %v861_v54 }
 0x28e   : > { %1307 = shalt.err (!%p1304_p3)
}
 0x28f   : > { %s1308_s8 = scalar_lea.hbm %s1692_s17, 2048  ;;  %s1312_s14 = scalar_lea.hbm %s1747_s7, 4096 }
 0x290   : > { %p1309_p4 = scmp.ne.s32.totalorder %s1692_s17, %s1308_s8  ;;  %p1313_p9 = scmp.lt.s32.totalorder %s1692_s17, %s1747_s7 }
 0x291   : > { %p1314_p10 = scmp.lt.s32.totalorder %s1312_s14, %s1308_s8 }
 0x292   : > { %p1310_p7 = pnand %p1309_p4, %p1437_p5 }
 0x293   : > { %p1315_p11 = por %p1314_p10, %p1313_p9 }
 0x294   : > { %p1311_p8 = pneg %p1310_p7 }
 0x296   : > { %p1316_p12 = pnand %p1315_p11, %p1311_p8 }
 0x298   : > { %1319 = shalt.err (!%p1316_p12)
}
 0x299   : > { %s1357_s19 = smov 128   ;;  %s1358_s20 = smov 8  }
 0x29a   : > { %1253 = dma.vmem_to_hbm [thread:$0]  (%p1437_p5), %s1694_s16, 2048, %s1692_s17, %s1700_s28, %s1357_s19, %s1357_s19, %s1358_s20  }
 0x29b PF: > { %p1259_p13 = scmp.ge.s32.totalorder %s1354_s27, 2  ;;  %s914_s21 = sand.u32 1, %s1342_s24  }
 0x29c   : > { %s915_s22 = scalar_lea.sflag [#allocation3], %s914_s21 }
 0x29d   : > { %p1256_p0 = pnand %p1259_p13, %p1441_p6 }
 0x29f   : > { %p1257_p1 = pneg %p1256_p0 }
 0x2a1   : > { %1337 = dma.done.wait (%p1257_p1), %s915_s22, 2048  }
 0x2a2   : > { %1339 = vsyncadd (%p1257_p1), %s915_s22, 4294965248  ;;  %p17_p2 = scmp.ge.s32.totalorder %s1424_s30, 4   ;;  %s1750_s24 = smov %s1346_s25 }
 0x2a3   : > { %s1751_s25 = smov %s1350_s26  ;;  %s1752_s26 = smov %s1435_s10 }
 0x2a4   : > { %s1753_s27 = smov %s1424_s30  ;;  %19 = sbr.rel (!%p17_p2) target bundleno = 3 (0x3), region = 83 }
 0x2a9   :  { %920 = vsyncpa [#allocation3], 1 }
 0x2aa   :  { %922 = vsyncpa [#allocation3 + $0x1], 1 }

</bundles_post_ra>
